<compile_context>
chip_gen: v6e
topology: v6e:2x2x1
jax: 0.10.0
libtpu: 0.0.40
codegen_flags: <defaults>
</compile_context>

<pallas_src>
import functools

import jax
import jax.numpy as jnp
from jax.experimental import pallas as pl
from jax.experimental.pallas import tpu as pltpu

ALPHA = 0.75
GAMMA = 2.0   # fixed: pow(x, 2) implemented as x * x inside the kernel
EPS = 1e-6


def _focal_loss_kernel(x_ref, tgt_ref, out_ref, *, n_valid, tile_l):
    x = x_ref[...]                    # [C, TL] f32 logits, lane-dense
    tgt = tgt_ref[...]                # [1, TL] i32 class indices

    # Per-sample softmax pieces: classes live on the sublane axis, so the
    # max/sum are cheap sublane (XLU) reductions; exp is the only full-tile
    # transcendental and it now runs on a dense tile.
    m = jnp.max(x, axis=0, keepdims=True)                    # [1, TL]
    e = jnp.exp(x - m)                                       # [C, TL]
    sum_e = jnp.sum(e, axis=0, keepdims=True)                # [1, TL]

    # Gather the target-class numerator with a sublane-iota one-hot mask.
    cls = jax.lax.broadcasted_iota(jnp.int32, e.shape, 0)    # [C, TL]
    e_t = jnp.sum(jnp.where(cls == tgt, e, 0.0),
                  axis=0, keepdims=True)                     # [1, TL]

    # p_t = softmax(x)[target] + eps ; reciprocal-multiply instead of divide.
    p_t = e_t * pl.reciprocal(sum_e, approx=False) + EPS     # [1, TL]
    alpha_t = (1.0 - ALPHA) + tgt.astype(jnp.float32) * (2.0 * ALPHA - 1.0)
    t = 1.0 - p_t + EPS
    focal = -alpha_t * (t * t) * jnp.log(p_t)                # gamma==2 -> square

    i = pl.program_id(0)
    last = pl.num_programs(0) - 1

    # Only the last tile can contain padded samples -> only it pays the mask.
    @pl.when(i != last)
    def _():
        out_ref[0, 0] = jnp.sum(focal)

    @pl.when(i == last)
    def _():
        col = jax.lax.broadcasted_iota(jnp.int32, focal.shape, 1)
        valid = (i * tile_l + col) < n_valid
        out_ref[0, 0] = jnp.sum(jnp.where(valid, focal, 0.0))


def focal_loss(logits, targets, *, tile_l=4096):
    """logits: [N, C] float, targets: [N] int. Returns scalar float32 loss."""
    n, c = logits.shape

    # Class-major (lane-dense) layout: samples on the 128-lane axis.
    xt = logits.astype(jnp.float32).T            # [C, N]
    tgt = targets.astype(jnp.int32).reshape(1, n)  # [1, N]

    # Lane-axis tile: multiple of 128, capped so tiny N gets a single tile.
    tl = min(tile_l, ((n + 127) // 128) * 128)
    tl = max(128, (tl // 128) * 128)
    n_pad = ((n + tl - 1) // tl) * tl
    if n_pad != n:
        xt = jnp.pad(xt, ((0, 0), (0, n_pad - n)))
        tgt = jnp.pad(tgt, ((0, 0), (0, n_pad - n)))
    num_tiles = n_pad // tl

    kernel = functools.partial(_focal_loss_kernel, n_valid=n, tile_l=tl)
    cost = pl.CostEstimate(
        flops=12 * n * c,                     # subtract/mask/sum/fma-ish work
        transcendentals=n * c + 2 * n,        # exp over [N,C]; log + rcp over [N]
        bytes_accessed=4 * n * c + 4 * n + 4 * num_tiles,
    )

    partials = pl.pallas_call(
        kernel,
        out_shape=jax.ShapeDtypeStruct((num_tiles, 1), jnp.float32),
        grid=(num_tiles,),
        in_specs=[
            pl.BlockSpec((c, tl), lambda i: (0, i)),   # [C, TL] logits slab
            pl.BlockSpec((1, tl), lambda i: (0, i)),   # [1, TL] targets row
        ],
        out_specs=pl.BlockSpec((1, 1), lambda i: (i, 0),
                               memory_space=pltpu.SMEM),
        compiler_params=pltpu.CompilerParams(
            dimension_semantics=("parallel",)),
        cost_estimate=cost,
    )(xt, tgt)

    # Per-tile partial sums -> mean over the batch (divide once, outside).
    return jnp.sum(partials) / n


if __name__ == "__main__":
    key = jax.random.PRNGKey(0)
    k1, k2 = jax.random.split(key)

    N, C = 8, 16
    logits = jax.random.normal(k1, (N, C), dtype=jnp.float32)
    targets = jax.random.randint(k2, (N,), 0, C, dtype=jnp.int32)
    # PyTorch's F.one_hot infers width = max(target)+1; force it to equal C
    # so semantics line up exactly.
    targets = targets.at[0].set(C - 1)

    loss = focal_loss(logits, targets)
    jax.block_until_ready(loss)

    # Pure-JAX reference (exactly the PyTorch formula).
    prob = jax.nn.softmax(logits, axis=1) + EPS
    alpha_t = (1.0 - ALPHA) + targets.astype(jnp.float32) * (2.0 * ALPHA - 1.0)
    focal = -alpha_t[:, None] * jnp.power(1.0 - prob + EPS, GAMMA) * jnp.log(prob)
    one_hot = jax.nn.one_hot(targets, C, dtype=jnp.float32)
    ref = jnp.mean(jnp.sum(one_hot * focal, axis=1))

    assert jnp.allclose(loss, ref, rtol=1e-5, atol=1e-5), (loss, ref)
    print("KERNEL_OK")
</pallas_src>

<mosaic_0001>
module attributes {stable_mosaic.version = 11 : i64} {
  func.func @_focal_loss_kernel(%arg0: i32, %arg1: memref<16x128xf32, #tpu.memory_space<vmem>>, %arg2: memref<1x128xi32, #tpu.memory_space<vmem>>, %arg3: memref<1x1xf32, #tpu.memory_space<smem>>) attributes {dimension_semantics = [#tpu.dimension_semantics<parallel>], iteration_bounds = array<i64: 1>, scalar_prefetch = 0 : i64, scratch_operands = 0 : i64, tpu.core_type = #tpu.core_type<tc>, window_params = [{transform_indices = @transform_0, window_bounds = array<i64: 16, 128>}, {transform_indices = @transform_1, window_bounds = array<i64: 1, 128>}, {transform_indices = @transform_2, window_bounds = array<i64: 1, 1>}]} {
    %c0 = arith.constant 0 : index
    %c0_0 = arith.constant 0 : index
    %0 = vector.load %arg1[%c0, %c0_0] : memref<16x128xf32, #tpu.memory_space<vmem>>, vector<16x128xf32>
    %c0_1 = arith.constant 0 : index
    %c0_2 = arith.constant 0 : index
    %1 = vector.load %arg2[%c0_1, %c0_2] : memref<1x128xi32, #tpu.memory_space<vmem>>, vector<1x128xi32>
    %cst = arith.constant dense<0xFF800000> : vector<128xf32>
    %2 = vector.multi_reduction <maximumf>, %0, %cst [0] : vector<16x128xf32> to vector<128xf32>
    %3 = vector.shape_cast %2 : vector<128xf32> to vector<1x128xf32>
    %4 = vector.broadcast %3 : vector<1x128xf32> to vector<16x128xf32>
    %5 = arith.subf %0, %4 : vector<16x128xf32>
    %6 = math.exp %5 : vector<16x128xf32>
    %cst_3 = arith.constant dense<0.000000e+00> : vector<128xf32>
    %7 = vector.multi_reduction <add>, %6, %cst_3 [0] : vector<16x128xf32> to vector<128xf32>
    %8 = vector.shape_cast %7 : vector<128xf32> to vector<1x128xf32>
    %9 = tpu.iota {dimensions = array<i32: 0>} : vector<16x128xi32>
    %10 = vector.broadcast %1 : vector<1x128xi32> to vector<16x128xi32>
    %11 = arith.cmpi eq, %9, %10 : vector<16x128xi32>
    %cst_4 = arith.constant 0.000000e+00 : f32
    %12 = vector.broadcast %cst_4 : f32 to vector<16x128xf32>
    %13 = arith.select %11, %6, %12 : vector<16x128xi1>, vector<16x128xf32>
    %cst_5 = arith.constant dense<0.000000e+00> : vector<128xf32>
    %14 = vector.multi_reduction <add>, %13, %cst_5 [0] : vector<16x128xf32> to vector<128xf32>
    %15 = vector.shape_cast %14 : vector<128xf32> to vector<1x128xf32>
    %16 = tpu.reciprocal %8 : vector<1x128xf32> -> vector<1x128xf32>
    %17 = arith.mulf %15, %16 : vector<1x128xf32>
    %cst_6 = arith.constant 9.99999997E-7 : f32
    %18 = vector.broadcast %cst_6 : f32 to vector<1x128xf32>
    %19 = arith.addf %17, %18 : vector<1x128xf32>
    %20 = arith.sitofp %1 : vector<1x128xi32> to vector<1x128xf32>
    %cst_7 = arith.constant 5.000000e-01 : f32
    %21 = vector.broadcast %cst_7 : f32 to vector<1x128xf32>
    %22 = arith.mulf %20, %21 : vector<1x128xf32>
    %cst_8 = arith.constant 2.500000e-01 : f32
    %23 = vector.broadcast %cst_8 : f32 to vector<1x128xf32>
    %24 = arith.addf %23, %22 : vector<1x128xf32>
    %cst_9 = arith.constant 1.000000e+00 : f32
    %25 = vector.broadcast %cst_9 : f32 to vector<1x128xf32>
    %26 = arith.subf %25, %19 : vector<1x128xf32>
    %cst_10 = arith.constant 9.99999997E-7 : f32
    %27 = vector.broadcast %cst_10 : f32 to vector<1x128xf32>
    %28 = arith.addf %26, %27 : vector<1x128xf32>
    %cst_11 = arith.constant 0.000000e+00 : f32
    %29 = vector.broadcast %cst_11 : f32 to vector<1x128xf32>
    %30 = arith.subf %29, %24 : vector<1x128xf32>
    %31 = arith.mulf %28, %28 : vector<1x128xf32>
    %32 = arith.mulf %30, %31 : vector<1x128xf32>
    %33 = math.log %19 : vector<1x128xf32>
    %34 = arith.mulf %32, %33 : vector<1x128xf32>
    %c0_i32 = arith.constant 0 : i32
    %35 = arith.cmpi ne, %arg0, %c0_i32 : i32
    %36 = arith.extui %35 : i1 to i32
    %c0_i32_12 = arith.constant 0 : i32
    %37 = arith.cmpi ne, %36, %c0_i32_12 : i32
    scf.if %37 {
      %41 = vector.shape_cast %34 : vector<1x128xf32> to vector<1x1x128xf32>
      %cst_15 = arith.constant dense<0.000000e+00> : vector<1xf32>
      %42 = vector.multi_reduction <add>, %41, %cst_15 [1, 2] : vector<1x1x128xf32> to vector<1xf32>
      %43 = vector.shape_cast %42 : vector<1xf32> to vector<1x1x1xf32>
      %44 = vector.extract %43[0, 0, 0] : f32 from vector<1x1x1xf32>
      %c0_16 = arith.constant 0 : index
      %c0_17 = arith.constant 0 : index
      %45 = memref.load %arg3[%c0_16, %c0_17] : memref<1x1xf32, #tpu.memory_space<smem>>
      memref.store %44, %arg3[%c0_16, %c0_17] : memref<1x1xf32, #tpu.memory_space<smem>>
    } else {
    }
    %c0_i32_13 = arith.constant 0 : i32
    %38 = arith.cmpi eq, %arg0, %c0_i32_13 : i32
    %39 = arith.extui %38 : i1 to i32
    %c0_i32_14 = arith.constant 0 : i32
    %40 = arith.cmpi ne, %39, %c0_i32_14 : i32
    scf.if %40 {
      %41 = tpu.iota {dimensions = array<i32: 1>} : vector<1x128xi32>
      %c128_i32 = arith.constant 128 : i32
      %42 = arith.muli %arg0, %c128_i32 : i32
      %43 = vector.broadcast %42 : i32 to vector<1x128xi32>
      %44 = arith.addi %43, %41 : vector<1x128xi32>
      %c8_i32 = arith.constant 8 : i32
      %45 = vector.broadcast %c8_i32 : i32 to vector<1x128xi32>
      %46 = arith.cmpi slt, %44, %45 : vector<1x128xi32>
      %cst_15 = arith.constant 0.000000e+00 : f32
      %47 = vector.broadcast %cst_15 : f32 to vector<1x128xf32>
      %48 = arith.select %46, %34, %47 : vector<1x128xi1>, vector<1x128xf32>
      %49 = vector.shape_cast %48 : vector<1x128xf32> to vector<1x1x128xf32>
      %cst_16 = arith.constant dense<0.000000e+00> : vector<1xf32>
      %50 = vector.multi_reduction <add>, %49, %cst_16 [1, 2] : vector<1x1x128xf32> to vector<1xf32>
      %51 = vector.shape_cast %50 : vector<1xf32> to vector<1x1x1xf32>
      %52 = vector.extract %51[0, 0, 0] : f32 from vector<1x1x1xf32>
      %c0_17 = arith.constant 0 : index
      %c0_18 = arith.constant 0 : index
      %53 = memref.load %arg3[%c0_17, %c0_18] : memref<1x1xf32, #tpu.memory_space<smem>>
      memref.store %52, %arg3[%c0_17, %c0_18] : memref<1x1xf32, #tpu.memory_space<smem>>
    } else {
    }
    return
  }
  func.func @transform_0(%arg0: i32) -> (i32, i32) {
    %c0_i32 = arith.constant 0 : i32
    %c0_i32_0 = arith.constant 0 : i32
    return %c0_i32, %arg0 : i32, i32
  }
  func.func @transform_1(%arg0: i32) -> (i32, i32) {
    %c0_i32 = arith.constant 0 : i32
    %c0_i32_0 = arith.constant 0 : i32
    return %c0_i32, %arg0 : i32, i32
  }
  func.func @transform_2(%arg0: i32) -> (i32, i32) {
    %c0_i32 = arith.constant 0 : i32
    %c0_i32_0 = arith.constant 0 : i32
    return %arg0, %c0_i32 : i32, i32
  }
}

</mosaic_0001>

<bundles_post_ra>
// kernel: tpu_custom_call.1
= control target key start
LH: loop header
LB: loop body
LE: loop exit
PB: predicated region body
PF: predicated region fallthrough
CT: control target
= control target key end

     0   :  { %7 = vsyncpa [#allocation3], 0  ;;  %s210_s0 = inlined_call_operand.hbm [shape: f32[16,128], index: 0, kind: input, shape index: {}]   ;;  %s211_s1 = inlined_call_operand.vmem [shape: s32[1,128], index: 1, kind: input, shape index: {}]   ;;  %s212_s2 = inlined_call_operand.hbm [shape: f32[1,1], index: 2, kind: output, shape index: {}]  }
   0x1   :  { %8 = vsyncpa [#allocation4], 0  ;;  %s182_s9 = smov [#allocation2]  }
   0x2   :  { %s14_s10 = sshll.u32 %s182_s9, 4  ;;  %s15_s10 = int_to_ptr.vmem [resolvable:$true] %s14_s10 }
   0x3   :  { %s158_s11 = scalar_lea.vmem %s15_s10, 256  ;;  %p163_p1 = scmp.lt.s32.totalorder %s15_s10, %s15_s10 }
   0x4   :  { %p159_p0 = scmp.ne.s32.totalorder %s15_s10, %s158_s11  ;;  %p164_p2 = scmp.lt.s32.totalorder %s158_s11, %s158_s11 }
   0x6   :  { %p165_p3 = por %p164_p2, %p163_p1 }
   0x8   :  { %p166_p4 = pnand %p165_p3, %p159_p0 }
   0xa   :  { %169 = shalt.err (!%p166_p4)
}
   0xb   :  { %s183_s12 = smov 128   ;;  %s184_s13 = smov 8  }
   0xc   :  { %20 = dma.hbm_to_vmem [thread:$0]  %s210_s0, 256, %s15_s10, [#allocation3], %s183_s12, %s183_s12, %s184_s13  }
   0xd   :  { %178 = dma.done.wait [#allocation3], 256  }
   0xe   :  { %179 = vsyncadd [#allocation3], 4294967040  ;;  %v26_v0 = vld [vmem:[#allocation2] sm:$0xff]  ;;  %v27_v1 = vld [vmem:[#allocation2 + $0x8] sm:$0xff]  ;;  %v49_v9 = vlaneseq  ;;  %vm109_vm3 = vcmask 1040384   ;;  %s185_s17 = smov [#allocation5]  }
   0xf   :  { %v29_v2 = vmax.f32 %v26_v0, %v27_v1  ;;  %v28_v16 = vld [vmem:[%s211_s1] sm:$0x1] }
  0x10   :  { %v50_v14 = vshrl.u32 %v49_v9, 7  ;;  %v70_v39 = vcvt.s32.f32 %v28_v16  ;;  %v103_v47 = vand.u32 127, %v49_v9 }
  0x11   :  { %v30_v3 = vrot.slane %v29_v2, 4 }
  0x12   :  { %v54_v15 = vsub.s32 0, %v50_v14  ;;  %v51_v18 = vadd.s32 8, %v50_v14  ;;  %v71_v41 = vmul.f32 0.5, %v70_v39  ;;  %vm107_vm2 = vcmp.lt.s32.totalorder %v103_v47, 8 }
  0x13   :  { %v31_v4 = vmax.f32 %v29_v2, %v30_v3 }
  0x14   :  { %v55_v17 = vrot.slane %v28_v16, %v54_v15  ;;  %v72_v43 = vadd.f32 0.25, %v71_v41 }
  0x15   :  { %v32_v5 = vrot.slane %v31_v4, 2 }
  0x16   :  { %vm56_vm0 = vcmp.eq.s32.totalorder %v50_v14, %v55_v17  ;;  %vm57_vm1 = vcmp.eq.s32.totalorder %v51_v18, %v55_v17  ;;  %v75_v45 = vsub.f32 0.0, %v72_v43 }
  0x17   :  { %v33_v6 = vmax.f32 %v31_v4, %v32_v5 }
  0x19   :  { %v34_v7 = vrot.slane %v33_v6, 1 }
  0x1b   :  { %v35_v8 = vmax.f32 %v33_v6, %v34_v7 }
  0x1d   :  { %v36_v10 = vsub.f32 %v26_v0, %v35_v8  ;;  %v37_v11 = vsub.f32 %v27_v1, %v35_v8 }
  0x1f   :  { %v38_v12 = vmul.f32 1.442695, %v36_v10  ;;  %v40_v13 = vmul.f32 1.442695, %v37_v11 }
  0x21   :  { %142 = vpow2.f32 %v38_v12 }
  0x22   :  { %144 = vpow2.f32 %v40_v13 }
  0x2e   :  { %v143_v19 = vpop.eup %142 }
  0x2f   :  { %v145_v20 = vpop.eup %144  ;;  %v58_v21 = vsel %vm56_vm0, %v143_v19, 0.0 }
  0x30   :  { %v42_v22 = vadd.f32 %v145_v20, %v143_v19  ;;  %v59_v23 = vsel %vm57_vm1, %v145_v20, 0.0 }
  0x31   :  { %v60_v24 = vadd.f32 %v59_v23, %v58_v21 }
  0x32   :  { %v43_v25 = vrot.slane %v42_v22, 4 }
  0x33   :  { %v61_v27 = vrot.slane %v60_v24, 4 }
  0x34   :  { %v44_v26 = vadd.f32 %v43_v25, %v42_v22 }
  0x35   :  { %v62_v30 = vadd.f32 %v61_v27, %v60_v24 }
  0x36   :  { %v45_v28 = vrot.slane %v44_v26, 2 }
  0x37   :  { %v63_v33 = vrot.slane %v62_v30, 2 }
  0x38   :  { %v46_v29 = vadd.f32 %v45_v28, %v44_v26 }
  0x39   :  { %v64_v34 = vadd.f32 %v63_v33, %v62_v30 }
  0x3a   :  { %v47_v31 = vrot.slane %v46_v29, 1 }
  0x3b   :  { %v65_v35 = vrot.slane %v64_v34, 1 }
  0x3c   :  { %v48_v32 = vadd.f32 %v47_v31, %v46_v29 }
  0x3d   :  { %v66_v36 = vadd.f32 %v65_v35, %v64_v34 }
  0x3e   :  { %146 = vrcp.f32 %v48_v32 }
  0x4b   :  { %v147_v37 = vpop.eup %146 }
  0x4c   :  { %v68_v38 = vmul.f32 %v147_v37, %v66_v36 }
  0x4e   :  { %v69_v40 = vadd.f32 1e-06, %v68_v38 }
  0x50   :  { %v73_v42 = vsub.f32 1.0, %v69_v40  ;;  %148 = vlog2.f32 %v69_v40 }
  0x52   :  { %v74_v44 = vadd.f32 1e-06, %v73_v42 }
  0x54   :  { %v76_v46 = vmul.f32 %v74_v44, %v74_v44 }
  0x56   :  { %v77_v48 = vmul.f32 %v76_v46, %v75_v45 }
  0x5d   :  { %v149_v49 = vpop.eup %148 }
  0x5e   :  { %v79_v50 = vmul.f32 0.6931472, %v149_v49 }
  0x60   :  { %v80_v51 = vmul.f32 %v79_v50, %v77_v48 }
  0x62   :  { %v108_v52 = vsel %vm107_vm2, %v80_v51, 0.0 }
  0x63   :  { %v110_v53 = vsel %vm109_vm3, %v108_v52, 0.0 }
  0x64   :  { %111 = vadd.xlane.f32.xlu0 %v110_v53 }
  0xed   :  { %v112_v54 = vpop.xlane.xlu0 %111 }
  0xee   :  { %v113_v55 = vrot.slane %v112_v54, 4 }
  0xf0   :  { %v114_v56 = vadd.f32 %v113_v55, %v112_v54 }
  0xf2   :  { %v115_v57 = vrot.slane %v114_v56, 2 }
  0xf4   :  { %v116_v58 = vadd.f32 %v115_v57, %v114_v56 }
  0xf6   :  { %v117_v59 = vrot.slane %v116_v58, 1 }
  0xf8   :  { %v118_v60 = vadd.f32 %v117_v59, %v116_v58 }
  0xfa   :  { %136 = vpush %v118_v60 }
 0x12b   :  { %s137_s1 = spop %136 }
 0x12c   :  { %121 = sst [smem:[#allocation5]] %s137_s1 }
 0x12d   :  { %129 = dma.smem_to_hbm %s185_s17, 16, %s212_s2, [#allocation4]  }
 0x12e   :  { %180 = dma.done.wait [#allocation4], 16  }
 0x12f   :  { %181 = vsyncadd [#allocation4], 4294967280 }
 0x130   :  { %133 = sfence }
 0x131   :  { %134 = vsyncpa [#allocation3], 1 }
 0x132   :  { %135 = vsyncpa [#allocation4], 1 }

</bundles_post_ra>
